<compile_context>
chip_gen: v6e
topology: v6e:2x2x1
jax: 0.10.0
libtpu: 0.0.40
codegen_flags: <defaults>
</compile_context>

<pallas_src>
import numpy as np
import jax
import jax.numpy as jnp
from jax.experimental import pallas as pl
from jax.experimental.pallas import tpu as pltpu


def _make_ldam_tile_kernel(s: float, n_real: int, tile_n: int, c: int):
    def kernel(x_ref, tgt_ref, m_ref, part_ref):
        pid = pl.program_id(0)

        x = x_ref[...].astype(jnp.float32)          # [TILE_N, C]
        tgt = tgt_ref[...]                          # [TILE_N, 1] int32
        m = m_ref[...]                              # [1, C] f32 margins

        # Boolean one-hot mask via iota compare (replaces torch scatter_).
        class_ids = jax.lax.broadcasted_iota(jnp.int32, (tile_n, c), 1)
        is_target = class_ids == tgt                # [TILE_N, C] bool

        # At the target column the broadcast m row equals m[target], so this
        # is exactly torch.where(index, x - batch_m, x) with no extra
        # cross-lane reduction.
        z = s * jnp.where(is_target, x - m, x)      # [TILE_N, C]

        # Stable log-softmax cross-entropy (3 cross-lane reductions total).
        zmax = jnp.max(z, axis=1, keepdims=True)                       # [TILE_N, 1]
        lse = zmax + jnp.log(jnp.sum(jnp.exp(z - zmax), axis=1, keepdims=True))
        z_t = jnp.sum(jnp.where(is_target, z, 0.0), axis=1, keepdims=True)
        per_sample = lse - z_t                                         # [TILE_N, 1]

        # Mask rows that are batch padding (global row >= n_real).
        row_ids = pid * tile_n + jax.lax.broadcasted_iota(
            jnp.int32, (tile_n, 1), 0)
        per_sample = jnp.where(row_ids < n_real, per_sample, 0.0)

        partial = jnp.sum(per_sample)               # scalar f32 partial sum
        # Lane/sublane-aligned (1,8,128) write: unmasked stores, independent
        # per grid step -> batch axis can be "parallel".
        part_ref[...] = jnp.full((1, 8, 128), partial, dtype=jnp.float32)

    return kernel


def _pick_tile_n(n: int, c: int, itemsize: int):
    """Return (tile_n, vmem_limit_bytes), generation-aware."""
    # Generation-aware VMEM budget: v5e/v6e have 128 MiB physical VMEM per TC,
    # v7x only 64 MiB, so cap the working set accordingly.
    try:
        cap = int(pltpu.get_tpu_info().vmem_capacity_bytes)
    except Exception:
        cap = 64 << 20                               # conservative (v7x-sized)
    vmem_budget = (96 << 20) if cap >= (100 << 20) else (44 << 20)

    # Sublane-packing alignment: 8 rows for f32, 16 for bf16, 32 for int8/fp8.
    align = max(8, 32 // max(1, itemsize))

    # Per-row VMEM cost: double-buffered logits block + ~4x f32 in-kernel
    # temporaries (upcast x / mask / z / exp) + double-buffered lane-padded
    # targets row. Fixed: sublane-padded margins + output/slack.
    per_row = 2 * c * itemsize + 4 * c * 4 + 2 * 128 * 4
    fixed = 2 * 8 * c * 4 + (64 << 10)

    t_vmem = (vmem_budget - fixed) // per_row
    t_block = (8 << 20) // max(1, c * itemsize)      # ~8 MiB HBM step target
    t = min(t_vmem, t_block, 8192)
    t = max(align, (t // align) * align)

    n_aligned = -(-n // align) * align
    t = min(t, n_aligned)

    # Guarantee >= 2 grid steps when possible so both v7x TensorCores get work
    # (negligible extra step overhead on single-TC v5e/v6e).
    if n_aligned >= 2 * align and t > (n_aligned + 1) // 2:
        half = -(-n_aligned // 2)
        t = min(-(-half // align) * align, n_aligned)

    return t, vmem_budget


def _ldam_loss_xla(x, target, m_list, s):
    """Plain-XLA path (used for C < 128, where lane waste makes Pallas lose)."""
    n, c = x.shape
    xf = x.astype(jnp.float32)
    onehot = jax.nn.one_hot(target, c, dtype=jnp.float32)
    batch_m = jnp.sum(onehot * m_list[None, :].astype(jnp.float32),
                      axis=1, keepdims=True)
    z = s * jnp.where(onehot > 0, xf - batch_m, xf)
    logp = jax.nn.log_softmax(z, axis=1)
    nll = -jnp.take_along_axis(logp, target[:, None].astype(jnp.int32), axis=1)[:, 0]
    return jnp.mean(nll)


def ldam_loss_pallas(x, target, m_list, s=30.0):
    """x: [N, C] float (f32 or bf16), target: [N] int, m_list: [C] -> scalar f32."""
    n, c = x.shape

    if c < 128:
        # Fewer than 128 classes: every vector op would use only C of the 128
        # lanes and lane padding inflates VMEM ~128/C x -> plain XLA wins.
        return _ldam_loss_xla(x, target, m_list, s)

    itemsize = jnp.dtype(x.dtype).itemsize
    tile_n, vmem_limit = _pick_tile_n(n, c, itemsize)
    num_tiles = -(-n // tile_n)
    n_pad = num_tiles * tile_n

    if n_pad != n:
        x = jnp.pad(x, ((0, n_pad - n), (0, 0)))
        target = jnp.pad(target, (0, n_pad - n))

    tgt2d = target.reshape(n_pad, 1).astype(jnp.int32)
    m2d = m_list.reshape(1, c).astype(jnp.float32)

    cost = pl.CostEstimate(
        flops=5 * n * c,
        transcendentals=n * c,
        bytes_accessed=n * c * itemsize + n * 4 + c * 4 + num_tiles * 8 * 128 * 4,
    )

    partials = pl.pallas_call(
        _make_ldam_tile_kernel(float(s), n, tile_n, c),
        out_shape=jax.ShapeDtypeStruct((num_tiles, 8, 128), jnp.float32),
        grid=(num_tiles,),
        in_specs=[
            pl.BlockSpec((tile_n, c), lambda i: (i, 0)),   # logits tile
            pl.BlockSpec((tile_n, 1), lambda i: (i, 0)),   # targets tile
            pl.BlockSpec((1, c), lambda i: (0, 0)),        # margins (resident)
        ],
        out_specs=pl.BlockSpec((1, 8, 128), lambda i: (i, 0, 0)),
        compiler_params=pltpu.CompilerParams(
            dimension_semantics=("parallel",),
            vmem_limit_bytes=int(vmem_limit),
        ),
        cost_estimate=cost,
    )(x, tgt2d, m2d)

    # Tiny final reduction + mean in plain XLA.
    return jnp.sum(partials[:, 0, 0]) / jnp.float32(n)


def ldam_loss_ref(x, target, m_list, s=30.0):
    """Pure-JAX reference mirroring the PyTorch module."""
    n, c = x.shape
    xf = x.astype(jnp.float32)
    onehot = jax.nn.one_hot(target, c, dtype=jnp.float32)
    batch_m = (m_list[None, :].astype(jnp.float32) @ onehot.T).reshape(-1, 1)
    out = jnp.where(onehot > 0, xf - batch_m, xf)
    z = s * out
    logp = jax.nn.log_softmax(z, axis=1)
    nll = -jnp.take_along_axis(logp, target[:, None].astype(jnp.int32), axis=1)[:, 0]
    return jnp.mean(nll)


if __name__ == "__main__":
    # Deterministic "parameters" (module __init__): cls_num_list -> m_list.
    num_classes = 128
    cls_num_list = np.maximum(2.0, 1000.0 * (0.96 ** np.arange(num_classes)))
    max_m = 0.5
    s = 30.0
    m_np = 1.0 / np.sqrt(np.sqrt(cls_num_list))
    m_np = m_np * (max_m / np.max(m_np))
    m_list = jnp.asarray(m_np, dtype=jnp.float32)

    # Deterministic example inputs (C=128 so the Pallas path is exercised).
    batch = 64
    key = jax.random.PRNGKey(0)
    kx, kt = jax.random.split(key)
    x = jax.random.normal(kx, (batch, num_classes), dtype=jnp.float32)
    target = jax.random.randint(kt, (batch,), 0, num_classes, dtype=jnp.int32)

    # f32 Pallas path
    loss = jax.block_until_ready(ldam_loss_pallas(x, target, m_list, s=s))
    ref = jax.block_until_ready(ldam_loss_ref(x, target, m_list, s=s))
    assert np.allclose(np.asarray(loss), np.asarray(ref), rtol=1e-5, atol=1e-5), \
        (loss, ref)

    # bf16 Pallas path (halved HBM traffic; kernel upcasts internally).
    x_bf16 = x.astype(jnp.bfloat16)
    loss_bf = jax.block_until_ready(ldam_loss_pallas(x_bf16, target, m_list, s=s))
    ref_bf = jax.block_until_ready(ldam_loss_ref(x_bf16, target, m_list, s=s))
    assert np.allclose(np.asarray(loss_bf), np.asarray(ref_bf),
                       rtol=2e-2, atol=2e-2), (loss_bf, ref_bf)

    # Small-C path exercises the plain-XLA fallback (C < 128 -> lane waste).
    c_small = 16
    m_small = jnp.asarray(m_np[:c_small], dtype=jnp.float32)
    x_s = jax.random.normal(kx, (8, c_small), dtype=jnp.float32)
    t_s = jax.random.randint(kt, (8,), 0, c_small, dtype=jnp.int32)
    loss_s = jax.block_until_ready(ldam_loss_pallas(x_s, t_s, m_small, s=s))
    ref_s = jax.block_until_ready(ldam_loss_ref(x_s, t_s, m_small, s=s))
    assert np.allclose(np.asarray(loss_s), np.asarray(ref_s),
                       rtol=1e-5, atol=1e-5), (loss_s, ref_s)

    print("KERNEL_OK")
</pallas_src>

<mosaic_0001>
module attributes {stable_mosaic.version = 11 : i64} {
  func.func @kernel(%arg0: i32, %arg1: memref<32x128xf32, #tpu.memory_space<vmem>>, %arg2: memref<32x1xi32, #tpu.memory_space<vmem>>, %arg3: memref<1x128xf32, #tpu.memory_space<vmem>>, %arg4: memref<1x8x128xf32, #tpu.memory_space<vmem>>) attributes {dimension_semantics = [#tpu.dimension_semantics<parallel>], iteration_bounds = array<i64: 2>, scalar_prefetch = 0 : i64, scratch_operands = 0 : i64, tpu.core_type = #tpu.core_type<tc>, window_params = [{transform_indices = @transform_0, window_bounds = array<i64: 32, 128>}, {transform_indices = @transform_1, window_bounds = array<i64: 32, 1>}, {pipeline_mode = #tpu.pipeline_mode<synchronous>, transform_indices = @transform_2, window_bounds = array<i64: 1, 128>}, {transform_indices = @transform_3, window_bounds = array<i64: 1, 8, 128>}]} {
    %c0 = arith.constant 0 : index
    %c0_0 = arith.constant 0 : index
    %0 = vector.load %arg1[%c0, %c0_0] : memref<32x128xf32, #tpu.memory_space<vmem>>, vector<32x128xf32>
    %c0_1 = arith.constant 0 : index
    %c0_2 = arith.constant 0 : index
    %1 = vector.load %arg2[%c0_1, %c0_2] : memref<32x1xi32, #tpu.memory_space<vmem>>, vector<32x1xi32>
    %c0_3 = arith.constant 0 : index
    %c0_4 = arith.constant 0 : index
    %2 = vector.load %arg3[%c0_3, %c0_4] : memref<1x128xf32, #tpu.memory_space<vmem>>, vector<1x128xf32>
    %3 = tpu.iota {dimensions = array<i32: 1>} : vector<32x128xi32>
    %4 = vector.broadcast %1 : vector<32x1xi32> to vector<32x128xi32>
    %5 = arith.cmpi eq, %3, %4 : vector<32x128xi32>
    %6 = vector.broadcast %2 : vector<1x128xf32> to vector<32x128xf32>
    %7 = arith.subf %0, %6 : vector<32x128xf32>
    %8 = arith.select %5, %7, %0 : vector<32x128xi1>, vector<32x128xf32>
    %cst = arith.constant 3.000000e+01 : f32
    %9 = vector.broadcast %cst : f32 to vector<32x128xf32>
    %10 = arith.mulf %9, %8 : vector<32x128xf32>
    %cst_5 = arith.constant dense<0xFF800000> : vector<32xf32>
    %11 = vector.multi_reduction <maximumf>, %10, %cst_5 [1] : vector<32x128xf32> to vector<32xf32>
    %12 = vector.shape_cast %11 : vector<32xf32> to vector<32x1xf32>
    %13 = vector.broadcast %12 : vector<32x1xf32> to vector<32x128xf32>
    %14 = arith.subf %10, %13 : vector<32x128xf32>
    %15 = math.exp %14 : vector<32x128xf32>
    %cst_6 = arith.constant dense<0.000000e+00> : vector<32xf32>
    %16 = vector.multi_reduction <add>, %15, %cst_6 [1] : vector<32x128xf32> to vector<32xf32>
    %17 = vector.shape_cast %16 : vector<32xf32> to vector<32x1xf32>
    %18 = math.log %17 : vector<32x1xf32>
    %19 = arith.addf %12, %18 : vector<32x1xf32>
    %cst_7 = arith.constant 0.000000e+00 : f32
    %20 = vector.broadcast %cst_7 : f32 to vector<32x128xf32>
    %21 = arith.select %5, %10, %20 : vector<32x128xi1>, vector<32x128xf32>
    %cst_8 = arith.constant dense<0.000000e+00> : vector<32xf32>
    %22 = vector.multi_reduction <add>, %21, %cst_8 [1] : vector<32x128xf32> to vector<32xf32>
    %23 = vector.shape_cast %22 : vector<32xf32> to vector<32x1xf32>
    %24 = arith.subf %19, %23 : vector<32x1xf32>
    %c32_i32 = arith.constant 32 : i32
    %25 = arith.muli %arg0, %c32_i32 : i32
    %26 = tpu.iota {dimensions = array<i32: 0>} : vector<32x1xi32>
    %27 = vector.broadcast %25 : i32 to vector<32x1xi32>
    %28 = arith.addi %27, %26 : vector<32x1xi32>
    %c64_i32 = arith.constant 64 : i32
    %29 = vector.broadcast %c64_i32 : i32 to vector<32x1xi32>
    %30 = arith.cmpi slt, %28, %29 : vector<32x1xi32>
    %cst_9 = arith.constant 0.000000e+00 : f32
    %31 = vector.broadcast %cst_9 : f32 to vector<32x1xf32>
    %32 = arith.select %30, %24, %31 : vector<32x1xi1>, vector<32x1xf32>
    %33 = vector.shape_cast %32 : vector<32x1xf32> to vector<1x32x1xf32>
    %cst_10 = arith.constant dense<0.000000e+00> : vector<1xf32>
    %34 = vector.multi_reduction <add>, %33, %cst_10 [1, 2] : vector<1x32x1xf32> to vector<1xf32>
    %35 = vector.shape_cast %34 : vector<1xf32> to vector<1x1x1xf32>
    %36 = vector.extract %35[0, 0, 0] : f32 from vector<1x1x1xf32>
    %37 = vector.broadcast %36 : f32 to vector<1x8x128xf32>
    %c0_11 = arith.constant 0 : index
    %c0_12 = arith.constant 0 : index
    %c0_13 = arith.constant 0 : index
    %38 = vector.load %arg4[%c0_11, %c0_12, %c0_13] : memref<1x8x128xf32, #tpu.memory_space<vmem>>, vector<1x8x128xf32>
    tpu.vector_store %arg4[%c0_11, %c0_12, %c0_13], %37 {strides = array<i32>} : memref<1x8x128xf32, #tpu.memory_space<vmem>>, vector<1x8x128xf32>,
    return
  }
  func.func @transform_0(%arg0: i32) -> (i32, i32) {
    %c0_i32 = arith.constant 0 : i32
    %c0_i32_0 = arith.constant 0 : i32
    return %arg0, %c0_i32 : i32, i32
  }
  func.func @transform_1(%arg0: i32) -> (i32, i32) {
    %c0_i32 = arith.constant 0 : i32
    %c0_i32_0 = arith.constant 0 : i32
    return %arg0, %c0_i32 : i32, i32
  }
  func.func @transform_2(%arg0: i32) -> (i32, i32) {
    %c0_i32 = arith.constant 0 : i32
    %c0_i32_0 = arith.constant 0 : i32
    %c0_i32_1 = arith.constant 0 : i32
    return %c0_i32, %c0_i32_0 : i32, i32
  }
  func.func @transform_3(%arg0: i32) -> (i32, i32, i32) {
    %c0_i32 = arith.constant 0 : i32
    %c0_i32_0 = arith.constant 0 : i32
    %c0_i32_1 = arith.constant 0 : i32
    return %arg0, %c0_i32, %c0_i32_0 : i32, i32, i32
  }
}

</mosaic_0001>

<bundles_post_ra>
// kernel: tpu_custom_call.1
= control target key start
LH: loop header
LB: loop body
LE: loop exit
PB: predicated region body
PF: predicated region fallthrough
CT: control target
= control target key end

     0   :  { %8 = vsyncpa [#allocation3], 0  ;;  %s693_s0 = inlined_call_operand.vmem [shape: f32[64,128], index: 0, kind: input, shape index: {}]   ;;  %s694_s1 = inlined_call_operand.vmem [shape: s32[64,1], index: 1, kind: input, shape index: {}]   ;;  %s695_s2 = inlined_call_operand.vmem [shape: f32[1,128], index: 2, kind: input, shape index: {}]   ;;  %s696_s3 = inlined_call_operand.hbm [shape: f32[2,8,128], index: 3, kind: output, shape index: {}]  }
   0x1   :  { %10 = vsyncpa [#allocation3 + $0x1], 0  ;;  %s576_s12 = smov 0   ;;  %s578_s13 = smov 0  }
   0x2   :  { %s580_s14 = smov 0   ;;  %s582_s15 = smov 0  }
   0x3 LB: > { %s597_s16 = sadd.s32 4294967295, %s552_s15   ;;  %s417_s17 = sadd.s32 4294967294, %s552_s15   ;;  %s552_s15 = sphi %s582_s15, %s702_s15   ;;  %s548_s14 = sphi %s580_s14, %s701_s14   ;;  %s544_s13 = sphi %s578_s13, %s700_s13   ;;  %s540_s12 = sphi %s576_s12, %s699_s12  }
   0x4   : > { %s601_s18 = sadd.s32 1, %s552_s15   ;;  %s96_s19 = sadd.s32 1, %s548_s14 }
   0x5   : > { %s93_s20 = ssub.s32 %s552_s15, %s601_s18  ;;  %p106_p0 = scmp.ne.s32.totalorder %s548_s14, %s544_s13 }
   0x6   : > { %p94_p1 = scmp.eq.s32.totalorder %s93_s20, 0  ;;  %p107_p2 = scmp.eq.s32.totalorder %s597_s16, 1 }
   0x7   : > { %p112_p3 = scmp.ne.s32.totalorder %s544_s13, %s540_s12  ;;  %p113_p4 = scmp.eq.s32.totalorder %s417_s17, 1 }
   0x8   : > { %s612_s21 = scalar_select %p94_p1, %s548_s14, %s96_s19  }
   0x9   : > { %p614_p5 = por %p107_p2, %p106_p0  ;;  %p618_p6 = por %p113_p4, %p112_p3 }
   0xa   : > { %p420_p7 = scmp.ge.s32.totalorder %s552_s15, 1  ;;  %p152_p8 = scmp.lt.s32.totalorder %s552_s15, 3 }
   0xc   : > { %p153_p9 = pnand %p420_p7, %p152_p8 }
   0xd   : > { %s422_s24 = sshll.u32 (!%p153_p9), %s597_s16, 2  ;;  %s427_s7 = sshll.u32 (!%p153_p9), %s597_s16, 5 }
   0xe   : > { %156 = sbr.rel (%p153_p9) target bundleno = 691 (0x2b3), region = 32  ;;  %p182_p10 = scmp.lt.s32.totalorder (!%p153_p9), %s422_s24, 7 }
   0xf   : > { %s178_s8 = sand.u32 (!%p153_p9), 1, %s544_s13   ;;  %s429_s17 = sshll.u32 (!%p153_p9), %s597_s16, 7 }
  0x10   : > { %s421_s9 = sshll.u32 (!%p153_p9), %s178_s8, 3  ;;  %s333_s26 = scalar_lea.sflag (!%p153_p9), [#allocation3], %s178_s8 }
  0x11   : > { %s180_s10 = scalar_lea.vmem (!%p153_p9), [#allocation2], %s421_s9 }
  0x12   : > { %s346_s11 = sshll.u32 (!%p153_p9), %s180_s10, 4  ;;  %s655_s11 = int_to_ptr.vmem [resolvable:$true] %s346_s11 }
  0x13   : > { %v554_v0 = vmov 0   ;;  %s704_s24 = smov (!%p182_p10, %s422_s24), 7  ;;  %v202_v5 = vlaneseq  ;;  %v426_v6 = vld [vmem:[%s695_s2] ss:$0 sm:$0xff]  ;;  %v300_v53 = vstv %s427_s7  ;;  %vm313_vm5 = vcmask 7168   ;;  %s492_s27 = scalar_lea.vmem %s655_s11, 128 }
  0x14   : > { %475 = vset.pattern.permute.xlu1 %v554_v0  ;;  %474 = vset.pattern.permute.xlu0 %v554_v0  ;;  %s423_s25 = sshll.u32 %s704_s24, 3  ;;  %p493_p11 = scmp.ne.s32.totalorder %s655_s11, %s492_s27 }
  0x15   : > { %s191_s28 = scalar_lea.vmem %s694_s1, %s423_s25  ;;  %s185_s4 = scalar_lea.vmem %s693_s0, %s423_s25  ;;  %v203_v8 = vand.u32 127, %v202_v5  ;;  %v296_v52 = vshrl.u32 %v202_v5, 7 }
  0x16   : > { %v199_v1 = vld [vmem:[%s191_s28 + $0x10] sm:$0xff]  ;;  %v197_v2 = vld [vmem:[%s191_s28] sm:$0xff]  ;;  %v200_v3 = vld [vmem:[%s191_s28 + $0x18] sm:$0xff]  ;;  %s344_s25 = scalar_lea.hbm %s696_s3, %s429_s17  ;;  %p494_p12 = pnand %p493_p11, %p614_p5 }
  0x17   : > { %211 = vperm.xlu1 %475, %v199_v1   ;;  %205 = vperm.xlu0 %474, %v197_v2   ;;  %v198_v4 = vld [vmem:[%s191_s28 + $0x8] sm:$0xff]  ;;  %v193_v7 = vld [vmem:[%s185_s4] sm:$0xff]  ;;  %v195_v9 = vld [vmem:[%s185_s4 + $0x10] sm:$0xff]  ;;  %v297_v55 = vadd.s32 8, %v296_v52  ;;  %v298_v57 = vadd.s32 16, %v296_v52  ;;  %v301_v58 = vadd.s32 %v300_v53, %v296_v52  ;;  %v299_v63 = vadd.s32 24, %v296_v52 }
  0x18   : > { %v226_v10 = vsub.f32 %v193_v7, %v426_v6  ;;  %v194_v11 = vld [vmem:[%s185_s4 + $0x8] sm:$0xff]  ;;  %v228_v13 = vsub.f32 %v195_v9, %v426_v6  ;;  %v196_v15 = vld [vmem:[%s185_s4 + $0x18] sm:$0xff]  ;;  %p495_p13 = pneg %p494_p12  ;;  %s555_s28 = smov [#allocation2]  }
  0x19   : > { %v227_v17 = vsub.f32 %v194_v11, %v426_v6  ;;  %v229_v21 = vsub.f32 %v196_v15, %v426_v6  ;;  %v302_v62 = vadd.s32 %v300_v53, %v297_v55  ;;  %vm305_vm4 = vcmp.lt.s32.totalorder %v301_v58, 64  ;;  %s496_s16 = sshll.u32 %s555_s28, 4  ;;  %s497_s16 = int_to_ptr.vmem [resolvable:$false] %s496_s16 }
  0x1a   : > { %s498_s29 = scalar_lea.vmem %s497_s16, 256  ;;  %p499_p0 = scmp.lt.s32.totalorder %s655_s11, %s497_s16 }
  0x1b   : > { %214 = vperm.xlu1 %475, %v200_v3   ;;  %208 = vperm.xlu0 %474, %v198_v4   ;;  %v303_v3 = vadd.s32 %v300_v53, %v298_v57  ;;  %vm306_vm6 = vcmp.lt.s32.totalorder %v302_v62, 64  ;;  %p500_p1 = scmp.lt.s32.totalorder %s498_s29, %s492_s27 }
  0x1d   : > { %vm307_vm7 = vcmp.lt.s32.totalorder %v303_v3, 64  ;;  %p501_p2 = por %p500_p1, %p499_p0 }
  0x1f   : > { %p502_p3 = pnand %p501_p2, %p495_p13 }
  0x92   : > { %v212_v12 = vpop.permute.xlu1 %211  ;;  %v206_v14 = vpop.permute.xlu0 %205 }
  0x93   : > { %vm218_vm0 = vcmp.eq.s32.totalorder %v203_v8, %v212_v12  ;;  %vm216_vm1 = vcmp.eq.s32.totalorder %v203_v8, %v206_v14 }
  0x94   : > { %v230_v16 = vsel %vm216_vm1, %v226_v10, %v193_v7  ;;  %v232_v19 = vsel %vm218_vm0, %v228_v13, %v195_v9  ;;  %v304_v9 = vadd.s32 %v300_v53, %v299_v63 }
  0x95   : > { %v234_v18 = vmul.f32 30.0, %v230_v16  ;;  %v236_v24 = vmul.f32 30.0, %v232_v19 }
  0x96   : > { %v215_v20 = vpop.permute.xlu1 %214  ;;  %v209_v22 = vpop.permute.xlu0 %208  ;;  %vm308_vm8 = vcmp.lt.s32.totalorder %v304_v9, 64 }
  0x97   : > { %vm219_vm2 = vcmp.eq.s32.totalorder %v203_v8, %v215_v20  ;;  %vm217_vm3 = vcmp.eq.s32.totalorder %v203_v8, %v209_v22  ;;  %238 = vmax.xlane.f32.xlu0 %v234_v18  ;;  %v278_v44 = vsel %vm216_vm1, %v234_v18, 0.0  ;;  %v280_v46 = vsel %vm218_vm0, %v236_v24, 0.0 }
  0x98   : > { %v231_v23 = vsel %vm217_vm3, %v227_v17, %v194_v11  ;;  %v233_v26 = vsel %vm219_vm2, %v229_v21, %v196_v15 }
  0x99   : > { %v235_v25 = vmul.f32 30.0, %v231_v23  ;;  %v237_v27 = vmul.f32 30.0, %v233_v26 }
  0x9b   : > { %240 = vmax.xlane.f32.xlu1 %v235_v25  ;;  %242 = vmax.xlane.f32.xlu0 %v236_v24  ;;  %v279_v45 = vsel %vm217_vm3, %v235_v25, 0.0  ;;  %v281_v47 = vsel %vm219_vm2, %v237_v27, 0.0 }
  0x9f   : > { %244 = vmax.xlane.f32.xlu0 %v237_v27 }
 0x120   : > { %v239_v28 = vpop.xlane.xlu0 %238 }
 0x121   : > { %v246_v29 = vsub.f32 %v234_v18, %v239_v28 }
 0x123   : > { %v250_v30 = vmul.f32 1.442695, %v246_v29 }
 0x124   : > { %v241_v31 = vpop.xlane.xlu1 %240  ;;  %v243_v32 = vpop.xlane.xlu0 %242 }
 0x125   : > { %476 = vpow2.f32 %v250_v30  ;;  %v247_v33 = vsub.f32 %v235_v25, %v241_v31  ;;  %v248_v34 = vsub.f32 %v236_v24, %v243_v32 }
 0x127   : > { %v252_v35 = vmul.f32 1.442695, %v247_v33  ;;  %v254_v36 = vmul.f32 1.442695, %v248_v34 }
 0x128   : > { %v639_v37 = vpop.xlane.xlu0 %244 }
 0x129   : > { %478 = vpow2.f32 %v252_v35  ;;  %v249_v38 = vsub.f32 %v237_v27, %v639_v37 }
 0x12a   : > { %480 = vpow2.f32 %v254_v36 }
 0x12b   : > { %v256_v39 = vmul.f32 1.442695, %v249_v38 }
 0x12d   : > { %482 = vpow2.f32 %v256_v39 }
 0x132   : > { %v477_v40 = vpop.eup %476 }
 0x133   : > { %258 = vadd.xlane.f32.xlu1 %v477_v40 }
 0x136   : > { %v479_v41 = vpop.eup %478 }
 0x137   : > { %v481_v42 = vpop.eup %480  ;;  %260 = vadd.xlane.f32.xlu0 %v479_v41 }
 0x138   : > { %262 = vadd.xlane.f32.xlu1 %v481_v42 }
 0x13a   : > { %v483_v43 = vpop.eup %482 }
 0x13b   : > { %264 = vadd.xlane.f32.xlu0 %v483_v43 }
 0x13c   : > { %282 = vadd.xlane.f32.xlu1 %v278_v44 }
 0x13f   : > { %284 = vadd.xlane.f32.xlu0 %v279_v45 }
 0x140   : > { %286 = vadd.xlane.f32.xlu1 %v280_v46 }
 0x143   : > { %288 = vadd.xlane.f32.xlu0 %v281_v47 }
 0x1bc   : > { %v259_v48 = vpop.xlane.xlu1 %258 }
 0x1bd   : > { %484 = vlog2.f32 %v259_v48 }
 0x1c0   : > { %v261_v49 = vpop.xlane.xlu0 %260 }
 0x1c1   : > { %v263_v50 = vpop.xlane.xlu1 %262  ;;  %486 = vlog2.f32 %v261_v49 }
 0x1c2   : > { %488 = vlog2.f32 %v263_v50 }
 0x1c4   : > { %v265_v51 = vpop.xlane.xlu0 %264 }
 0x1c5   : > { %490 = vlog2.f32 %v265_v51  ;;  %v283_v60 = vpop.xlane.xlu1 %282 }
 0x1c8   : > { %v285_v6 = vpop.xlane.xlu0 %284 }
 0x1c9   : > { %v287_v13 = vpop.xlane.xlu1 %286 }
 0x1ca   : > { %v485_v54 = vpop.eup %484 }
 0x1cb   : > { %v267_v56 = vmul.f32 0.6931472, %v485_v54 }
 0x1cc   : > { %v289_v20 = vpop.xlane.xlu0 %288 }
 0x1cd   : > { %v274_v59 = vadd.f32 %v267_v56, %v239_v28 }
 0x1ce   : > { %v487_v61 = vpop.eup %486 }
 0x1cf   : > { %v489_v0 = vpop.eup %488  ;;  %v269_v1 = vmul.f32 0.6931472, %v487_v61  ;;  %v290_v2 = vsub.f32 %v274_v59, %v283_v60 }
 0x1d0   : > { %v271_v4 = vmul.f32 0.6931472, %v489_v0 }
 0x1d1   : > { %v275_v7 = vadd.f32 %v269_v1, %v241_v31  ;;  %v309_v11 = vsel %vm305_vm4, %v290_v2, 0.0 }
 0x1d2   : > { %v491_v5 = vpop.eup %490  ;;  %v276_v8 = vadd.f32 %v271_v4, %v243_v32  ;;  %v314_v17 = vsel %vm313_vm5, %v309_v11, 0.0 }
 0x1d3   : > { %v273_v10 = vmul.f32 0.6931472, %v491_v5  ;;  %v291_v12 = vsub.f32 %v275_v7, %v285_v6 }
 0x1d4   : > { %v292_v14 = vsub.f32 %v276_v8, %v287_v13 }
 0x1d5   : > { %v310_v15 = vsel %vm306_vm6, %v291_v12, 0.0  ;;  %v277_v16 = vadd.f32 %v273_v10, %v639_v37 }
 0x1d6   : > { %v315_v18 = vsel %vm313_vm5, %v310_v15, 0.0  ;;  %v311_v19 = vsel %vm307_vm7, %v292_v14, 0.0 }
 0x1d7   : > { %v316_v21 = vadd.f32 %v315_v18, %v314_v17  ;;  %v293_v22 = vsub.f32 %v277_v16, %v289_v20  ;;  %v317_v23 = vsel %vm313_vm5, %v311_v19, 0.0 }
 0x1d9   : > { %v312_v24 = vsel %vm308_vm8, %v293_v22, 0.0  ;;  %v318_v25 = vadd.f32 %v317_v23, %v316_v21 }
 0x1da   : > { %v319_v26 = vsel %vm313_vm5, %v312_v24, 0.0 }
 0x1db   : > { %v320_v27 = vadd.f32 %v319_v26, %v318_v25 }
 0x1dd   : > { %321 = vadd.xlane.f32.xlu1 %v320_v27 }
 0x266   : > { %v322_v28 = vpop.xlane.xlu1 %321 }
 0x267   : > { %v323_v29 = vrot.slane %v322_v28, 4 }
 0x269   : > { %v324_v30 = vadd.f32 %v323_v29, %v322_v28 }
 0x26b   : > { %v325_v31 = vrot.slane %v324_v30, 2 }
 0x26d   : > { %v326_v32 = vadd.f32 %v325_v31, %v324_v30 }
 0x26f   : > { %v327_v33 = vrot.slane %v326_v32, 1 }
 0x271   : > { %v328_v34 = vadd.f32 %v327_v33, %v326_v32 }
 0x273   : > { %432 = vpush %v328_v34 }
 0x2a4   : > { %s433_s19 = spop %432 }
 0x2a5   : > { %v330_v35 = vstv %s433_s19 }
 0x2a6   : > { %331 = vst [vmem:[%s180_s10] sm:$0xff] %v330_v35 }
 0x2a7   : > { %505 = shalt.err (!%p502_p3)
}
 0x2a8   : > { %s506_s30 = scalar_lea.hbm %s344_s25, 128  ;;  %s510_s6 = scalar_lea.hbm %s696_s3, 256 }
 0x2a9   : > { %p507_p4 = scmp.ne.s32.totalorder %s344_s25, %s506_s30  ;;  %p511_p9 = scmp.lt.s32.totalorder %s344_s25, %s696_s3 }
 0x2aa   : > { %p512_p10 = scmp.lt.s32.totalorder %s510_s6, %s506_s30 }
 0x2ab   : > { %p508_p7 = pnand %p507_p4, %p614_p5 }
 0x2ac   : > { %p513_p11 = por %p512_p10, %p511_p9 }
 0x2ad   : > { %p509_p8 = pneg %p508_p7 }
 0x2af   : > { %p514_p12 = pnand %p513_p11, %p509_p8 }
 0x2b1   : > { %517 = shalt.err (!%p514_p12)
}
 0x2b2   : > { %434 = dma.vmem_to_hbm [thread:$0]  (%p614_p5), %s655_s11, 128, %s344_s25, %s333_s26  }
 0x2b3 PF: > { %p440_p13 = scmp.ge.s32.totalorder %s552_s15, 2  ;;  %s358_s9 = sand.u32 1, %s540_s12  }
 0x2b4   : > { %s359_s10 = scalar_lea.sflag [#allocation3], %s358_s9 }
 0x2b5   : > { %p437_p0 = pnand %p440_p13, %p618_p6 }
 0x2b7   : > { %p438_p1 = pneg %p437_p0 }
 0x2b9   : > { %535 = dma.done.wait (%p438_p1), %s359_s10, 128  }
 0x2ba   : > { %537 = vsyncadd (%p438_p1), %s359_s10, 4294967168  ;;  %p13_p2 = scmp.ge.s32.totalorder %s601_s18, 4   ;;  %s699_s12 = smov %s544_s13 }
 0x2bb   : > { %s700_s13 = smov %s548_s14  ;;  %s701_s14 = smov %s612_s21 }
 0x2bc   : > { %s702_s15 = smov %s601_s18  ;;  %15 = sbr.rel (!%p13_p2) target bundleno = 3 (0x3), region = 70 }
 0x2c1   :  { %364 = vsyncpa [#allocation3], 1 }
 0x2c2   :  { %366 = vsyncpa [#allocation3 + $0x1], 1 }

</bundles_post_ra>
